<compile_context>
chip_gen: v7x
topology: tpu7x:2x2x1
jax: 0.10.0
libtpu: 0.0.40
codegen_flags: <defaults>
</compile_context>

<pallas_src>
import jax
import jax.numpy as jnp
from jax.experimental import pallas as pl
from jax.experimental.pallas import tpu as pltpu


def mlp_kernel(x_ref, w1_ref, b1_ref, w2_ref, b2_ref, o_ref):
    # Hidden layer: (TILE_B, 17)bf16 @ (17, H)bf16 -> f32 accum, +bias, ReLU.
    h = jnp.dot(x_ref[...], w1_ref[...], preferred_element_type=jnp.float32)
    h = jnp.maximum(h + b1_ref[...], 0.0)
    # Output layer: (TILE_B, H)bf16 @ (H, 2)bf16 -> f32 accum, +bias.
    out = jnp.dot(h.astype(w2_ref.dtype), w2_ref[...],
                  preferred_element_type=jnp.float32)
    o_ref[...] = (out + b2_ref[...]).astype(o_ref.dtype)


def _round_up(n, m):
    return ((n + m - 1) // m) * m


def netmonk_forward(x, w1, b1, w2, b2, *, tile_b_max=4096):
    """x: (B, 17) f32; w1: (17, H); b1: (1, H); w2: (H, 2); b2: (1, 2).

    Returns (B, 2) f32 logits. Internally streams x as bf16 batch tiles.
    """
    B, K = x.shape
    H = w1.shape[1]
    out_dim = w2.shape[1]

    # bf16 for the streamed activation + weights; f32 accumulation in-kernel.
    xb = x.astype(jnp.bfloat16)
    w1b = w1.astype(jnp.bfloat16)
    w2b = w2.astype(jnp.bfloat16)
    b1f = b1.astype(jnp.float32)
    b2f = b2.astype(jnp.float32)

    # Pick a batch tile (multiple of 8) and pad B so the grid divides exactly.
    tile_b = min(tile_b_max, _round_up(B, 8))
    b_pad = _round_up(B, tile_b)
    if b_pad != B:
        xb = jnp.pad(xb, ((0, b_pad - B), (0, 0)))

    grid = (b_pad // tile_b,)

    flops = 2 * b_pad * (K * H + H * out_dim)
    bytes_accessed = (
        b_pad * K * 2                # x (bf16, read)
        + K * H * 2 + H * out_dim * 2  # weights (bf16)
        + H * 4 + out_dim * 4          # biases (f32)
        + b_pad * out_dim * 4          # output (f32, write)
    )

    out = pl.pallas_call(
        mlp_kernel,
        out_shape=jax.ShapeDtypeStruct((b_pad, out_dim), jnp.float32),
        grid_spec=pltpu.PrefetchScalarGridSpec(
            num_scalar_prefetch=0,
            grid=grid,
            in_specs=[
                # x streams in batch tiles (double-buffered by Pallas).
                pl.BlockSpec((tile_b, K), lambda i: (i, 0)),
                # Parameters: constant index_map -> resident across the grid.
                pl.BlockSpec((K, H), lambda i: (0, 0)),
                pl.BlockSpec((1, H), lambda i: (0, 0)),
                pl.BlockSpec((H, out_dim), lambda i: (0, 0)),
                pl.BlockSpec((1, out_dim), lambda i: (0, 0)),
            ],
            out_specs=pl.BlockSpec((tile_b, out_dim), lambda i: (i, 0)),
        ),
        compiler_params=pltpu.CompilerParams(
            dimension_semantics=("parallel",),
        ),
        cost_estimate=pl.CostEstimate(
            flops=flops, transcendentals=0, bytes_accessed=bytes_accessed),
    )(xb, w1b, b1f, w2b, b2f)

    return out[:B]


def xavier_uniform(key, fan_in, fan_out, gain):
    # Matches torch.nn.init.xavier_uniform_: U(-a, a), a = gain*sqrt(6/(fan_in+fan_out))
    a = gain * jnp.sqrt(6.0 / (fan_in + fan_out))
    return jax.random.uniform(key, (fan_in, fan_out), jnp.float32, minval=-a, maxval=a)


def _reference(x, w1, b1, w2, b2):
    # Pure-JAX reference using the same bf16-input / f32-accumulate recipe.
    xb = x.astype(jnp.bfloat16)
    w1b = w1.astype(jnp.bfloat16)
    w2b = w2.astype(jnp.bfloat16)
    h = jnp.dot(xb, w1b, preferred_element_type=jnp.float32) + b1
    h = jnp.maximum(h, 0.0)
    return jnp.dot(h.astype(jnp.bfloat16), w2b,
                   preferred_element_type=jnp.float32) + b2


if __name__ == "__main__":
    hidden_size = 32
    in_features = 17
    out_features = 2

    key = jax.random.PRNGKey(0)
    k_x1, k_x2, k_w1, k_w2 = jax.random.split(key, 4)

    gain_relu = jnp.sqrt(2.0)  # nn.init.calculate_gain('relu')
    w1 = xavier_uniform(k_w1, in_features, hidden_size, gain_relu)   # (17, H)
    b1 = jnp.zeros((1, hidden_size), jnp.float32)
    w2 = xavier_uniform(k_w2, hidden_size, out_features, gain_relu)  # (H, 2)
    b2 = jnp.zeros((1, out_features), jnp.float32)

    # Small single-tile case.
    batch = 8
    x = jax.random.normal(k_x1, (batch, in_features), jnp.float32)
    out = netmonk_forward(x, w1, b1, w2, b2)
    jax.block_until_ready(out)
    ref = _reference(x, w1, b1, w2, b2)
    assert out.shape == (batch, out_features)
    assert jnp.allclose(out, ref, atol=1e-4, rtol=1e-4)

    # Multi-tile case with a ragged batch (exercises grid + pad/slice path).
    batch2 = 200
    x2 = jax.random.normal(k_x2, (batch2, in_features), jnp.float32)
    out2 = netmonk_forward(x2, w1, b1, w2, b2, tile_b_max=64)
    jax.block_until_ready(out2)
    ref2 = _reference(x2, w1, b1, w2, b2)
    assert out2.shape == (batch2, out_features)
    assert jnp.allclose(out2, ref2, atol=1e-4, rtol=1e-4)

    print("KERNEL_OK")
</pallas_src>

<mosaic_0001>
module attributes {stable_mosaic.version = 11 : i64} {
  func.func @mlp_kernel(%arg0: i32, %arg1: memref<8x17xbf16, #tpu.memory_space<vmem>>, %arg2: memref<17x32xbf16, #tpu.memory_space<vmem>>, %arg3: memref<1x32xf32, #tpu.memory_space<vmem>>, %arg4: memref<32x2xbf16, #tpu.memory_space<vmem>>, %arg5: memref<1x2xf32, #tpu.memory_space<vmem>>, %arg6: memref<8x2xf32, #tpu.memory_space<vmem>>) attributes {dimension_semantics = [#tpu.dimension_semantics<parallel>], iteration_bounds = array<i64: 1>, scalar_prefetch = 0 : i64, scratch_operands = 0 : i64, tpu.core_type = #tpu.core_type<tc>, window_params = [{transform_indices = @transform_0, window_bounds = array<i64: 8, 17>}, {pipeline_mode = #tpu.pipeline_mode<synchronous>, transform_indices = @transform_1, window_bounds = array<i64: 17, 32>}, {pipeline_mode = #tpu.pipeline_mode<synchronous>, transform_indices = @transform_2, window_bounds = array<i64: 1, 32>}, {pipeline_mode = #tpu.pipeline_mode<synchronous>, transform_indices = @transform_3, window_bounds = array<i64: 32, 2>}, {pipeline_mode = #tpu.pipeline_mode<synchronous>, transform_indices = @transform_4, window_bounds = array<i64: 1, 2>}, {transform_indices = @transform_5, window_bounds = array<i64: 8, 2>}]} {
    %c0 = arith.constant 0 : index
    %c0_0 = arith.constant 0 : index
    %0 = vector.load %arg1[%c0, %c0_0] : memref<8x17xbf16, #tpu.memory_space<vmem>>, vector<8x17xbf16>
    %c0_1 = arith.constant 0 : index
    %c0_2 = arith.constant 0 : index
    %1 = vector.load %arg2[%c0_1, %c0_2] : memref<17x32xbf16, #tpu.memory_space<vmem>>, vector<17x32xbf16>
    %cst = arith.constant dense<0.000000e+00> : vector<8x32xf32>
    %2 = tpu.matmul %0, %1, %cst {dimension_numbers = #tpu.dot_dimension_numbers<[1], [0], [0], [1], [0, 0, 1, 1], [], []>} : vector<8x17xbf16>, vector<17x32xbf16>, vector<8x32xf32> -> vector<8x32xf32>
    %c0_3 = arith.constant 0 : index
    %c0_4 = arith.constant 0 : index
    %3 = vector.load %arg3[%c0_3, %c0_4] : memref<1x32xf32, #tpu.memory_space<vmem>>, vector<1x32xf32>
    %4 = vector.broadcast %3 : vector<1x32xf32> to vector<8x32xf32>
    %5 = arith.addf %2, %4 : vector<8x32xf32>
    %cst_5 = arith.constant 0.000000e+00 : f32
    %6 = vector.broadcast %cst_5 : f32 to vector<8x32xf32>
    %7 = arith.maximumf %5, %6 : vector<8x32xf32>
    %8 = arith.truncf %7 : vector<8x32xf32> to vector<8x32xbf16>
    %c0_6 = arith.constant 0 : index
    %c0_7 = arith.constant 0 : index
    %9 = vector.load %arg4[%c0_6, %c0_7] : memref<32x2xbf16, #tpu.memory_space<vmem>>, vector<32x2xbf16>
    %cst_8 = arith.constant dense<0.000000e+00> : vector<8x2xf32>
    %10 = tpu.matmul %8, %9, %cst_8 {dimension_numbers = #tpu.dot_dimension_numbers<[1], [0], [0], [1], [0, 0, 1, 1], [], []>} : vector<8x32xbf16>, vector<32x2xbf16>, vector<8x2xf32> -> vector<8x2xf32>
    %c0_9 = arith.constant 0 : index
    %c0_10 = arith.constant 0 : index
    %11 = vector.load %arg5[%c0_9, %c0_10] : memref<1x2xf32, #tpu.memory_space<vmem>>, vector<1x2xf32>
    %12 = vector.broadcast %11 : vector<1x2xf32> to vector<8x2xf32>
    %13 = arith.addf %10, %12 : vector<8x2xf32>
    %c0_11 = arith.constant 0 : index
    %c0_12 = arith.constant 0 : index
    %14 = vector.load %arg6[%c0_11, %c0_12] : memref<8x2xf32, #tpu.memory_space<vmem>>, vector<8x2xf32>
    tpu.vector_store %arg6[%c0_11, %c0_12], %13 {strides = array<i32>} : memref<8x2xf32, #tpu.memory_space<vmem>>, vector<8x2xf32>,
    return
  }
  func.func @transform_0(%arg0: i32) -> (i32, i32) {
    %c0_i32 = arith.constant 0 : i32
    %c0_i32_0 = arith.constant 0 : i32
    return %arg0, %c0_i32 : i32, i32
  }
  func.func @transform_1(%arg0: i32) -> (i32, i32) {
    %c0_i32 = arith.constant 0 : i32
    %c0_i32_0 = arith.constant 0 : i32
    %c0_i32_1 = arith.constant 0 : i32
    return %c0_i32, %c0_i32_0 : i32, i32
  }
  func.func @transform_2(%arg0: i32) -> (i32, i32) {
    %c0_i32 = arith.constant 0 : i32
    %c0_i32_0 = arith.constant 0 : i32
    %c0_i32_1 = arith.constant 0 : i32
    return %c0_i32, %c0_i32_0 : i32, i32
  }
  func.func @transform_3(%arg0: i32) -> (i32, i32) {
    %c0_i32 = arith.constant 0 : i32
    %c0_i32_0 = arith.constant 0 : i32
    %c0_i32_1 = arith.constant 0 : i32
    return %c0_i32, %c0_i32_0 : i32, i32
  }
  func.func @transform_4(%arg0: i32) -> (i32, i32) {
    %c0_i32 = arith.constant 0 : i32
    %c0_i32_0 = arith.constant 0 : i32
    %c0_i32_1 = arith.constant 0 : i32
    return %c0_i32, %c0_i32_0 : i32, i32
  }
  func.func @transform_5(%arg0: i32) -> (i32, i32) {
    %c0_i32 = arith.constant 0 : i32
    %c0_i32_0 = arith.constant 0 : i32
    return %arg0, %c0_i32 : i32, i32
  }
}

</mosaic_0001>

<bundles_post_ra>
// kernel: tpu_custom_call.1
= control target key start
LH: loop header
LB: loop body
LE: loop exit
PB: predicated region body
PF: predicated region fallthrough
CT: control target
= control target key end

     0   :  { %vm45_vm0 = vcmask 1040384   ;;  %v203_v0 = vmov 0.0   ;;  %v204_v2 = vmov 0   ;;  %vm205_vm1 = vmmov 0   ;;  %s260_s1 = inlined_call_operand.vmem [shape: bf16[17,32], index: 1, kind: input, shape index: {}]   ;;  %s261_s0 = inlined_call_operand.vmem [shape: bf16[8,17], index: 0, kind: input, shape index: {}]   ;;  %s262_s3 = inlined_call_operand.vmem [shape: bf16[32,2], index: 3, kind: input, shape index: {}]   ;;  %s263_s2 = inlined_call_operand.vmem [shape: f32[1,32], index: 2, kind: input, shape index: {}]   ;;  %s264_s4 = inlined_call_operand.vmem [shape: f32[1,2], index: 4, kind: input, shape index: {}]   ;;  %s265_s5 = inlined_call_operand.vmem [shape: f32[8,2], index: 5, kind: output, shape index: {}]  }
   0x1   :  { %180 = vmatprep.subr.bf16.mxu0 %v203_v0  ;;  %v199_v1 = vld [vmem:[%s260_s1] sm:$0xff]   ;;  %v47_v3 = vsel %vm45_vm0, 65535, %v204_v2  ;;  %184 = vmatprep.mubr.msk.bf16.mxu0 %vm205_vm1, %v203_v0  ;;  %v200_v4 = vld [vmem:[%s260_s1 + $0x8] ss:$0 sps:$4 sm:$0x11]   ;;  %vm41_vm2 = vcmask 138240  }
   0x2   :  { %188 = vmatprep.subr.bf16.mxu1 %v203_v0  ;;  %192 = vmatprep.mubr.msk.bf16.mxu1 %vm205_vm1, %v203_v0  ;;  %v49_v5 = vand.u32 %v200_v4, %v47_v3  ;;  %v21_v6 = vld [vmem:[%s261_s0] sm:$0xf]  ;;  %v202_v8 = vld [vmem:[%s262_s3 + $0x8] sm:$0xff]   ;;  %vm116_vm3 = vcmask 261120   ;;  %vm160_vm4 = vcmask 15360  }
   0x3   :  { %181 = vmatpush3.bf16.msra.mxu0 %v199_v1  ;;  %v201_v7 = vld [vmem:[%s262_s3] sm:$0xff]  }
   0x4   :  { %182 = vmatprep.subr.bf16.mxu0 %v203_v0  ;;  %189 = vmatpush3.bf16.msra.mxu1 %v201_v7  ;;  %v166_v9 = vld [vmem:[%s263_s2] ss:$0 sm:$0xff] }
   0x5   :  { %190 = vmatprep.subr.bf16.mxu1 %v203_v0  ;;  %v170_v17 = vld [vmem:[%s264_s4] ss:$0 sm:$0xff] }
   0x7   :  { %183 = vmatpush3.bf16.msra.mxu0 %v49_v5 }
   0x8   :  { %191 = vmatpush3.bf16.msra.mxu1 %v202_v8 }
   0xa   :  { %185 = vmatmul.mubr.msk.bf16.vlgmr.msra.gmra.mrb[0].mxu0 %vm41_vm2, %v21_v6 }
  0xdd   :  { %v85_v10 = vpop.f32.mrb[0].mxu0 }
  0xde   :  { %v86_v11 = vadd.f32 %v166_v9, %v85_v10  ;;  %v186_v12 = vpop.f32.mrb[1].mxu0 }
  0xdf   :  { %v88_v13 = vpop.f32.mrb[2].mxu0 }
  0xe0   :  { %v91_v14 = vmax.f32 %v86_v11, 0.0  ;;  %v187_v15 = vpop.f32.mrb[3].mxu0 }
  0xe2   :  { %v92_v16 = vpack.c.bf16 %v91_v14, %v91_v14 }
  0xe4   :  { %193 = vmatmul.mubr.msk.bf16.vlgmr.msra.gmra.mrb[0].mxu1 %vm116_vm3, %v92_v16 }
 0x1b7   :  { %v154_v18 = vpop.f32.mrb[0].mxu1 }
 0x1b8   :  { %v155_v19 = vadd.f32 %v170_v17, %v154_v18  ;;  %v194_v20 = vpop.f32.mrb[1].mxu1 }
 0x1b9   :  { %v157_v21 = vpop.f32.mrb[2].mxu1 }
 0x1ba   :  { %161 = vst.msk [vmem:[%s265_s5] sm:$0xff] %vm160_vm4, %v155_v19  ;;  %v195_v22 = vpop.f32.mrb[3].mxu1 }

</bundles_post_ra>
